<compile_context>
chip_gen: v7x
topology: tpu7x:2x2x1
jax: 0.10.0
libtpu: 0.0.40
codegen_flags: <defaults>
</compile_context>

<pallas_src>
import functools
import math

import jax
import jax.numpy as jnp
from jax.experimental import pallas as pl
from jax.experimental.pallas import tpu as pltpu


def _make_dgm_kernel(n_layers: int, hidden_dim: int):
    """Builds the kernel body with the layer loop statically unrolled."""
    H = hidden_dim
    L = n_layers

    def kernel(x_ref, wx_ref, wg_ref, wzr_ref, wh_ref, wout_ref, bout_ref,
               o_ref):
        # x_ref: (TB, D+1); last column is the constant 1 that carries biases.
        x = x_ref[...]

        # One fused, lane-dense x-path matmul (input layer + every U gate of
        # every block).  Bias rides the MXU pass via the constant-1 column.
        xa = jnp.dot(x, wx_ref[...],
                     preferred_element_type=jnp.float32)         # (TB, 4LH+H)

        # Input layer block sits at the end (128-lane aligned for H=64).
        s = jnp.tanh(xa[:, 4 * L * H: 4 * L * H + H])
        s_first = s

        # g-gate state path consumes only s_first -> one matmul for all L
        # layers; all g activations are computed OFF the serial chain.
        gx = jnp.dot(s_first, wg_ref[...],
                     preferred_element_type=jnp.float32)          # (TB, L*H)
        g_all = []
        for l in range(L):
            base = l * 4 * H
            g_all.append(jnp.tanh(xa[:, base + 3 * H: base + 4 * H]
                                  + gx[:, l * H: (l + 1) * H]))

        # Serial recurrence: per layer only one fused z/r matmul + tanh and
        # one h matmul + tanh remain on the critical path.
        for l in range(L):
            base = l * 4 * H
            zr = jnp.tanh(xa[:, base: base + 2 * H]
                          + jnp.dot(s, wzr_ref[l],
                                    preferred_element_type=jnp.float32))
            z = zr[:, 0:H]
            r = zr[:, H:2 * H]
            h = jnp.tanh(xa[:, base + 2 * H: base + 3 * H]
                         + jnp.dot(s * r, wh_ref[l],
                                   preferred_element_type=jnp.float32))
            s = (1.0 - g_all[l]) * h + z * s

        # Output layer (H -> 1) as a cross-lane reduction, not an N=1 MXU pass.
        o_ref[...] = (jnp.sum(s * wout_ref[...], axis=-1, keepdims=True)
                      + bout_ref[...])

    return kernel


def pack_params(params, n_layers: int, input_dim: int, hidden_dim: int):
    """One-time repack of module params into the fused, lane-aligned layout.

    Call this ONCE at init and reuse the result for every forward call.
    W_x column layout: [slab_0 | slab_1 | ... | slab_{L-1} | w_in], where each
    slab = [U_z | U_r | U_h | U_g] (4H lanes, 128-lane aligned).  The last row
    of W_x is the flattened bias (paired with a constant-1 column of x).
    """
    H, L, D = hidden_dim, n_layers, input_dim
    perm = (0, 2, 3, 1)                         # stored [z,g,r,h] -> [z,r,h,g]
    uw = params["U_w"][:, perm, :, :]           # (L, 4, D, H)
    ub = params["U_b"][:, perm, :, :]           # (L, 4, 1, H)
    uw_flat = jnp.transpose(uw, (2, 0, 1, 3)).reshape(D, L * 4 * H)
    ub_flat = jnp.transpose(ub, (2, 0, 1, 3)).reshape(1, L * 4 * H)

    w_cols = jnp.concatenate([uw_flat, params["w_in"]], axis=1)   # (D, 4LH+H)
    b_row = jnp.concatenate([ub_flat, params["b_in"]], axis=1)    # (1, 4LH+H)
    w_x = jnp.concatenate([w_cols, b_row], axis=0)                # (D+1, 4LH+H)

    ww = params["W_w"]                                            # (L,4,H,H)
    w_g = jnp.transpose(ww[:, 1], (1, 0, 2)).reshape(H, L * H)    # (H, L*H)
    w_zr = jnp.concatenate([ww[:, 0], ww[:, 2]], axis=-1)         # (L, H, 2H)
    w_h = ww[:, 3]                                                # (L, H, H)
    w_out_row = params["w_out"].T                                 # (1, H)
    return (w_x, w_g, w_zr, w_h, w_out_row, params["b_out"])


def dgm_forward(x, packed, *, n_layers: int, hidden_dim: int, block_b=None):
    """Runs the DGMNet forward pass with a single pallas_call.

    `packed` is the output of pack_params (computed once at init).  The batch
    is tiled with a parallel grid so large batches fill the MXU M dimension
    and shard across TensorCores; weights use constant index maps so they are
    DMA'd once and stay VMEM-resident.
    """
    B, D = x.shape
    w_x, w_g, w_zr, w_h, w_out_row, b_out = packed
    d_aug = D + 1

    # Fold biases into the MXU pass via a constant-1 column.
    x_aug = jnp.concatenate([x, jnp.ones((B, 1), x.dtype)], axis=1)

    if block_b is None:
        block_b = B
    assert B % block_b == 0, "batch must be a multiple of block_b"

    kernel = _make_dgm_kernel(n_layers, hidden_dim)

    def const_spec(shape):
        return pl.BlockSpec(shape, lambda i, _shape=shape: (0,) * len(_shape))

    in_specs = [
        pl.BlockSpec((block_b, d_aug), lambda i: (i, 0)),
        const_spec(w_x.shape),
        const_spec(w_g.shape),
        const_spec(w_zr.shape),
        const_spec(w_h.shape),
        const_spec(w_out_row.shape),
        const_spec(b_out.shape),
    ]
    out_specs = pl.BlockSpec((block_b, 1), lambda i: (i, 0))

    return pl.pallas_call(
        kernel,
        out_shape=jax.ShapeDtypeStruct((B, 1), jnp.float32),
        grid=(B // block_b,),
        in_specs=in_specs,
        out_specs=out_specs,
        compiler_params=pltpu.CompilerParams(
            dimension_semantics=("parallel",)),
    )(x_aug, w_x, w_g, w_zr, w_h, w_out_row, b_out)


def xavier_uniform(key, fan_in, fan_out, shape):
    bound = math.sqrt(6.0 / (fan_in + fan_out))
    return jax.random.uniform(key, shape, jnp.float32, -bound, bound)


def init_params(key, input_dim: int, hidden_dim: int, n_layers: int,
                nonzero_bias: bool = False):
    n_keys = 2 + n_layers * 8 + 3
    keys = jax.random.split(key, n_keys)
    ki = iter(range(n_keys))

    # Input layer (stored as (in, out)).
    w_in = xavier_uniform(keys[next(ki)], input_dim, hidden_dim,
                          (input_dim, hidden_dim))

    # DGM blocks: stacked gate weights, stored gate order [z, g, r, h].
    U_w, W_w = [], []
    for _ in range(n_layers):
        uws, wws = [], []
        for _ in range(4):
            uws.append(xavier_uniform(keys[next(ki)], input_dim, hidden_dim,
                                      (input_dim, hidden_dim)))
            wws.append(xavier_uniform(keys[next(ki)], hidden_dim, hidden_dim,
                                      (hidden_dim, hidden_dim)))
        U_w.append(jnp.stack(uws))                   # (4, D, H)
        W_w.append(jnp.stack(wws))                   # (4, H, H)
    U_w = jnp.stack(U_w)                             # (L, 4, D, H)
    W_w = jnp.stack(W_w)                             # (L, 4, H, H)

    # Output layer.
    w_out = xavier_uniform(keys[next(ki)], hidden_dim, 1, (hidden_dim, 1))

    if nonzero_bias:
        # Exercises the bias packing path (the PyTorch init zeros biases).
        b_in = 0.1 * jax.random.normal(keys[next(ki)], (1, hidden_dim),
                                       jnp.float32)
        U_b = 0.1 * jax.random.normal(keys[next(ki)],
                                      (n_layers, 4, 1, hidden_dim),
                                      jnp.float32)
        b_out = 0.1 * jax.random.normal(keys[next(ki)], (1, 1), jnp.float32)
    else:
        b_in = jnp.zeros((1, hidden_dim), jnp.float32)
        U_b = jnp.zeros((n_layers, 4, 1, hidden_dim), jnp.float32)
        b_out = jnp.zeros((1, 1), jnp.float32)

    return {"w_in": w_in, "b_in": b_in,
            "U_w": U_w, "U_b": U_b, "W_w": W_w,
            "w_out": w_out, "b_out": b_out}


def dgm_reference(x, params, n_layers: int):
    """Pure-JAX reference mirroring the PyTorch forward (highest precision)."""
    hp = jax.lax.Precision.HIGHEST
    dot = lambda a, b: jnp.dot(a, b, precision=hp)
    s = jnp.tanh(dot(x, params["w_in"]) + params["b_in"])
    s_first = s
    for l in range(n_layers):
        u = lambda g: dot(x, params["U_w"][l, g]) + params["U_b"][l, g]
        w = lambda v, g: dot(v, params["W_w"][l, g])
        z = jnp.tanh(u(0) + w(s, 0))
        gg = jnp.tanh(u(1) + w(s_first, 1))
        r = jnp.tanh(u(2) + w(s, 2))
        h = jnp.tanh(u(3) + w(s * r, 3))
        s = (1.0 - gg) * h + z * s
    return dot(s, params["w_out"]) + params["b_out"]


if __name__ == "__main__":
    # Module defaults: input_dim=5, hidden_dim=64, n_layers=3 (4H = 256 lanes
    # per gate slab -> every slab is 128-lane aligned).
    input_dim, hidden_dim, n_layers = 5, 64, 3

    key = jax.random.PRNGKey(0)
    kp1, kx1, kp2, kx2 = jax.random.split(key, 4)

    # --- Test 1: PyTorch-style init (zero biases), tiny batch, single step.
    params1 = init_params(kp1, input_dim, hidden_dim, n_layers,
                          nonzero_bias=False)
    packed1 = pack_params(params1, n_layers, input_dim, hidden_dim)  # once
    x1 = jax.random.normal(kx1, (8, input_dim), jnp.float32)
    fwd1 = jax.jit(functools.partial(dgm_forward, n_layers=n_layers,
                                     hidden_dim=hidden_dim, block_b=8))
    out1 = jax.block_until_ready(fwd1(x1, packed1))
    ref1 = dgm_reference(x1, params1, n_layers)
    assert out1.shape == (8, 1)
    err1 = float(jnp.max(jnp.abs(out1 - ref1)))
    assert err1 < 1e-3, f"test1 max abs err {err1}"

    # --- Test 2: nonzero biases (exercises the bias/layout packing) plus a
    #     multi-step parallel batch grid (weights stay VMEM-resident).
    params2 = init_params(kp2, input_dim, hidden_dim, n_layers,
                          nonzero_bias=True)
    packed2 = pack_params(params2, n_layers, input_dim, hidden_dim)  # once
    x2 = jax.random.normal(kx2, (256, input_dim), jnp.float32)
    fwd2 = jax.jit(functools.partial(dgm_forward, n_layers=n_layers,
                                     hidden_dim=hidden_dim, block_b=128))
    out2 = jax.block_until_ready(fwd2(x2, packed2))
    ref2 = dgm_reference(x2, params2, n_layers)
    assert out2.shape == (256, 1)
    err2 = float(jnp.max(jnp.abs(out2 - ref2)))
    assert err2 < 1e-3, f"test2 max abs err {err2}"

    print("KERNEL_OK")
</pallas_src>

<mosaic_0001>
module attributes {stable_mosaic.version = 11 : i64} {
  func.func @kernel(%arg0: i32, %arg1: memref<8x6xf32, #tpu.memory_space<vmem>>, %arg2: memref<6x832xf32, #tpu.memory_space<vmem>>, %arg3: memref<64x192xf32, #tpu.memory_space<vmem>>, %arg4: memref<3x64x128xf32, #tpu.memory_space<vmem>>, %arg5: memref<3x64x64xf32, #tpu.memory_space<vmem>>, %arg6: memref<1x64xf32, #tpu.memory_space<vmem>>, %arg7: memref<1x1xf32, #tpu.memory_space<vmem>>, %arg8: memref<8x1xf32, #tpu.memory_space<vmem>>) attributes {dimension_semantics = [#tpu.dimension_semantics<parallel>], iteration_bounds = array<i64: 1>, scalar_prefetch = 0 : i64, scratch_operands = 0 : i64, tpu.core_type = #tpu.core_type<tc>, window_params = [{transform_indices = @transform_0, window_bounds = array<i64: 8, 6>}, {pipeline_mode = #tpu.pipeline_mode<synchronous>, transform_indices = @transform_1, window_bounds = array<i64: 6, 832>}, {pipeline_mode = #tpu.pipeline_mode<synchronous>, transform_indices = @transform_2, window_bounds = array<i64: 64, 192>}, {pipeline_mode = #tpu.pipeline_mode<synchronous>, transform_indices = @transform_3, window_bounds = array<i64: 3, 64, 128>}, {pipeline_mode = #tpu.pipeline_mode<synchronous>, transform_indices = @transform_4, window_bounds = array<i64: 3, 64, 64>}, {pipeline_mode = #tpu.pipeline_mode<synchronous>, transform_indices = @transform_5, window_bounds = array<i64: 1, 64>}, {pipeline_mode = #tpu.pipeline_mode<synchronous>, transform_indices = @transform_6, window_bounds = array<i64: 1, 1>}, {transform_indices = @transform_7, window_bounds = array<i64: 8, 1>}]} {
    %c0 = arith.constant 0 : index
    %c0_0 = arith.constant 0 : index
    %0 = vector.load %arg1[%c0, %c0_0] : memref<8x6xf32, #tpu.memory_space<vmem>>, vector<8x6xf32>
    %c0_1 = arith.constant 0 : index
    %c0_2 = arith.constant 0 : index
    %1 = vector.load %arg2[%c0_1, %c0_2] : memref<6x832xf32, #tpu.memory_space<vmem>>, vector<6x832xf32>
    %cst = arith.constant dense<0.000000e+00> : vector<8x832xf32>
    %2 = tpu.matmul %0, %1, %cst {dimension_numbers = #tpu.dot_dimension_numbers<[1], [0], [0], [1], [0, 0, 1, 1], [], []>} : vector<8x6xf32>, vector<6x832xf32>, vector<8x832xf32> -> vector<8x832xf32>
    %3 = vector.extract_strided_slice %2 {offsets = [0, 768], sizes = [8, 64], strides = [1, 1]} : vector<8x832xf32> to vector<8x64xf32>
    %4 = math.tanh %3 : vector<8x64xf32>
    %c0_3 = arith.constant 0 : index
    %c0_4 = arith.constant 0 : index
    %5 = vector.load %arg3[%c0_3, %c0_4] : memref<64x192xf32, #tpu.memory_space<vmem>>, vector<64x192xf32>
    %cst_5 = arith.constant dense<0.000000e+00> : vector<8x192xf32>
    %6 = tpu.matmul %4, %5, %cst_5 {dimension_numbers = #tpu.dot_dimension_numbers<[1], [0], [0], [1], [0, 0, 1, 1], [], []>} : vector<8x64xf32>, vector<64x192xf32>, vector<8x192xf32> -> vector<8x192xf32>
    %7 = vector.extract_strided_slice %2 {offsets = [0, 192], sizes = [8, 64], strides = [1, 1]} : vector<8x832xf32> to vector<8x64xf32>
    %8 = vector.extract_strided_slice %6 {offsets = [0, 0], sizes = [8, 64], strides = [1, 1]} : vector<8x192xf32> to vector<8x64xf32>
    %9 = arith.addf %7, %8 : vector<8x64xf32>
    %10 = math.tanh %9 : vector<8x64xf32>
    %11 = vector.extract_strided_slice %2 {offsets = [0, 448], sizes = [8, 64], strides = [1, 1]} : vector<8x832xf32> to vector<8x64xf32>
    %12 = vector.extract_strided_slice %6 {offsets = [0, 64], sizes = [8, 64], strides = [1, 1]} : vector<8x192xf32> to vector<8x64xf32>
    %13 = arith.addf %11, %12 : vector<8x64xf32>
    %14 = math.tanh %13 : vector<8x64xf32>
    %15 = vector.extract_strided_slice %2 {offsets = [0, 704], sizes = [8, 64], strides = [1, 1]} : vector<8x832xf32> to vector<8x64xf32>
    %16 = vector.extract_strided_slice %6 {offsets = [0, 128], sizes = [8, 64], strides = [1, 1]} : vector<8x192xf32> to vector<8x64xf32>
    %17 = arith.addf %15, %16 : vector<8x64xf32>
    %18 = math.tanh %17 : vector<8x64xf32>
    %19 = vector.extract_strided_slice %2 {offsets = [0, 0], sizes = [8, 128], strides = [1, 1]} : vector<8x832xf32> to vector<8x128xf32>
    %c0_6 = arith.constant 0 : index
    %c0_7 = arith.constant 0 : index
    %c0_8 = arith.constant 0 : index
    %20 = vector.load %arg4[%c0_6, %c0_7, %c0_8] : memref<3x64x128xf32, #tpu.memory_space<vmem>>, vector<1x64x128xf32>
    %21 = vector.shape_cast %20 : vector<1x64x128xf32> to vector<64x128xf32>
    %cst_9 = arith.constant dense<0.000000e+00> : vector<8x128xf32>
    %22 = tpu.matmul %4, %21, %cst_9 {dimension_numbers = #tpu.dot_dimension_numbers<[1], [0], [0], [1], [0, 0, 1, 1], [], []>} : vector<8x64xf32>, vector<64x128xf32>, vector<8x128xf32> -> vector<8x128xf32>
    %23 = arith.addf %19, %22 : vector<8x128xf32>
    %24 = math.tanh %23 : vector<8x128xf32>
    %25 = vector.extract_strided_slice %24 {offsets = [0, 0], sizes = [8, 64], strides = [1, 1]} : vector<8x128xf32> to vector<8x64xf32>
    %26 = vector.extract_strided_slice %24 {offsets = [0, 64], sizes = [8, 64], strides = [1, 1]} : vector<8x128xf32> to vector<8x64xf32>
    %27 = vector.extract_strided_slice %2 {offsets = [0, 128], sizes = [8, 64], strides = [1, 1]} : vector<8x832xf32> to vector<8x64xf32>
    %28 = arith.mulf %4, %26 : vector<8x64xf32>
    %c0_10 = arith.constant 0 : index
    %c0_11 = arith.constant 0 : index
    %c0_12 = arith.constant 0 : index
    %29 = vector.load %arg5[%c0_10, %c0_11, %c0_12] : memref<3x64x64xf32, #tpu.memory_space<vmem>>, vector<1x64x64xf32>
    %30 = vector.shape_cast %29 : vector<1x64x64xf32> to vector<64x64xf32>
    %cst_13 = arith.constant dense<0.000000e+00> : vector<8x64xf32>
    %31 = tpu.matmul %28, %30, %cst_13 {dimension_numbers = #tpu.dot_dimension_numbers<[1], [0], [0], [1], [0, 0, 1, 1], [], []>} : vector<8x64xf32>, vector<64x64xf32>, vector<8x64xf32> -> vector<8x64xf32>
    %32 = arith.addf %27, %31 : vector<8x64xf32>
    %33 = math.tanh %32 : vector<8x64xf32>
    %cst_14 = arith.constant 1.000000e+00 : f32
    %34 = vector.broadcast %cst_14 : f32 to vector<8x64xf32>
    %35 = arith.subf %34, %10 : vector<8x64xf32>
    %36 = arith.mulf %35, %33 : vector<8x64xf32>
    %37 = arith.mulf %25, %4 : vector<8x64xf32>
    %38 = arith.addf %36, %37 : vector<8x64xf32>
    %39 = vector.extract_strided_slice %2 {offsets = [0, 256], sizes = [8, 128], strides = [1, 1]} : vector<8x832xf32> to vector<8x128xf32>
    %c1 = arith.constant 1 : index
    %c0_15 = arith.constant 0 : index
    %c0_16 = arith.constant 0 : index
    %40 = vector.load %arg4[%c1, %c0_15, %c0_16] : memref<3x64x128xf32, #tpu.memory_space<vmem>>, vector<1x64x128xf32>
    %41 = vector.shape_cast %40 : vector<1x64x128xf32> to vector<64x128xf32>
    %cst_17 = arith.constant dense<0.000000e+00> : vector<8x128xf32>
    %42 = tpu.matmul %38, %41, %cst_17 {dimension_numbers = #tpu.dot_dimension_numbers<[1], [0], [0], [1], [0, 0, 1, 1], [], []>} : vector<8x64xf32>, vector<64x128xf32>, vector<8x128xf32> -> vector<8x128xf32>
    %43 = arith.addf %39, %42 : vector<8x128xf32>
    %44 = math.tanh %43 : vector<8x128xf32>
    %45 = vector.extract_strided_slice %44 {offsets = [0, 0], sizes = [8, 64], strides = [1, 1]} : vector<8x128xf32> to vector<8x64xf32>
    %46 = vector.extract_strided_slice %44 {offsets = [0, 64], sizes = [8, 64], strides = [1, 1]} : vector<8x128xf32> to vector<8x64xf32>
    %47 = vector.extract_strided_slice %2 {offsets = [0, 384], sizes = [8, 64], strides = [1, 1]} : vector<8x832xf32> to vector<8x64xf32>
    %48 = arith.mulf %38, %46 : vector<8x64xf32>
    %c1_18 = arith.constant 1 : index
    %c0_19 = arith.constant 0 : index
    %c0_20 = arith.constant 0 : index
    %49 = vector.load %arg5[%c1_18, %c0_19, %c0_20] : memref<3x64x64xf32, #tpu.memory_space<vmem>>, vector<1x64x64xf32>
    %50 = vector.shape_cast %49 : vector<1x64x64xf32> to vector<64x64xf32>
    %cst_21 = arith.constant dense<0.000000e+00> : vector<8x64xf32>
    %51 = tpu.matmul %48, %50, %cst_21 {dimension_numbers = #tpu.dot_dimension_numbers<[1], [0], [0], [1], [0, 0, 1, 1], [], []>} : vector<8x64xf32>, vector<64x64xf32>, vector<8x64xf32> -> vector<8x64xf32>
    %52 = arith.addf %47, %51 : vector<8x64xf32>
    %53 = math.tanh %52 : vector<8x64xf32>
    %cst_22 = arith.constant 1.000000e+00 : f32
    %54 = vector.broadcast %cst_22 : f32 to vector<8x64xf32>
    %55 = arith.subf %54, %14 : vector<8x64xf32>
    %56 = arith.mulf %55, %53 : vector<8x64xf32>
    %57 = arith.mulf %45, %38 : vector<8x64xf32>
    %58 = arith.addf %56, %57 : vector<8x64xf32>
    %59 = vector.extract_strided_slice %2 {offsets = [0, 512], sizes = [8, 128], strides = [1, 1]} : vector<8x832xf32> to vector<8x128xf32>
    %c2 = arith.constant 2 : index
    %c0_23 = arith.constant 0 : index
    %c0_24 = arith.constant 0 : index
    %60 = vector.load %arg4[%c2, %c0_23, %c0_24] : memref<3x64x128xf32, #tpu.memory_space<vmem>>, vector<1x64x128xf32>
    %61 = vector.shape_cast %60 : vector<1x64x128xf32> to vector<64x128xf32>
    %cst_25 = arith.constant dense<0.000000e+00> : vector<8x128xf32>
    %62 = tpu.matmul %58, %61, %cst_25 {dimension_numbers = #tpu.dot_dimension_numbers<[1], [0], [0], [1], [0, 0, 1, 1], [], []>} : vector<8x64xf32>, vector<64x128xf32>, vector<8x128xf32> -> vector<8x128xf32>
    %63 = arith.addf %59, %62 : vector<8x128xf32>
    %64 = math.tanh %63 : vector<8x128xf32>
    %65 = vector.extract_strided_slice %64 {offsets = [0, 0], sizes = [8, 64], strides = [1, 1]} : vector<8x128xf32> to vector<8x64xf32>
    %66 = vector.extract_strided_slice %64 {offsets = [0, 64], sizes = [8, 64], strides = [1, 1]} : vector<8x128xf32> to vector<8x64xf32>
    %67 = vector.extract_strided_slice %2 {offsets = [0, 640], sizes = [8, 64], strides = [1, 1]} : vector<8x832xf32> to vector<8x64xf32>
    %68 = arith.mulf %58, %66 : vector<8x64xf32>
    %c2_26 = arith.constant 2 : index
    %c0_27 = arith.constant 0 : index
    %c0_28 = arith.constant 0 : index
    %69 = vector.load %arg5[%c2_26, %c0_27, %c0_28] : memref<3x64x64xf32, #tpu.memory_space<vmem>>, vector<1x64x64xf32>
    %70 = vector.shape_cast %69 : vector<1x64x64xf32> to vector<64x64xf32>
    %cst_29 = arith.constant dense<0.000000e+00> : vector<8x64xf32>
    %71 = tpu.matmul %68, %70, %cst_29 {dimension_numbers = #tpu.dot_dimension_numbers<[1], [0], [0], [1], [0, 0, 1, 1], [], []>} : vector<8x64xf32>, vector<64x64xf32>, vector<8x64xf32> -> vector<8x64xf32>
    %72 = arith.addf %67, %71 : vector<8x64xf32>
    %73 = math.tanh %72 : vector<8x64xf32>
    %cst_30 = arith.constant 1.000000e+00 : f32
    %74 = vector.broadcast %cst_30 : f32 to vector<8x64xf32>
    %75 = arith.subf %74, %18 : vector<8x64xf32>
    %76 = arith.mulf %75, %73 : vector<8x64xf32>
    %77 = arith.mulf %65, %58 : vector<8x64xf32>
    %78 = arith.addf %76, %77 : vector<8x64xf32>
    %c0_31 = arith.constant 0 : index
    %c0_32 = arith.constant 0 : index
    %79 = vector.load %arg6[%c0_31, %c0_32] : memref<1x64xf32, #tpu.memory_space<vmem>>, vector<1x64xf32>
    %80 = vector.broadcast %79 : vector<1x64xf32> to vector<8x64xf32>
    %81 = arith.mulf %78, %80 : vector<8x64xf32>
    %cst_33 = arith.constant dense<0.000000e+00> : vector<8xf32>
    %82 = vector.multi_reduction <add>, %81, %cst_33 [1] : vector<8x64xf32> to vector<8xf32>
    %83 = vector.shape_cast %82 : vector<8xf32> to vector<8x1xf32>
    %c0_34 = arith.constant 0 : index
    %c0_35 = arith.constant 0 : index
    %84 = vector.load %arg7[%c0_34, %c0_35] : memref<1x1xf32, #tpu.memory_space<vmem>>, vector<1x1xf32>
    %85 = vector.broadcast %84 : vector<1x1xf32> to vector<8x1xf32>
    %86 = arith.addf %83, %85 : vector<8x1xf32>
    %c0_36 = arith.constant 0 : index
    %c0_37 = arith.constant 0 : index
    %87 = vector.load %arg8[%c0_36, %c0_37] : memref<8x1xf32, #tpu.memory_space<vmem>>, vector<8x1xf32>
    tpu.vector_store %arg8[%c0_36, %c0_37], %86 {strides = array<i32>} : memref<8x1xf32, #tpu.memory_space<vmem>>, vector<8x1xf32>,
    return
  }
  func.func @transform_0(%arg0: i32) -> (i32, i32) {
    %c0_i32 = arith.constant 0 : i32
    %c0_i32_0 = arith.constant 0 : i32
    return %arg0, %c0_i32 : i32, i32
  }
  func.func @transform_1(%arg0: i32) -> (i32, i32) {
    %c0_i32 = arith.constant 0 : i32
    %c0_i32_0 = arith.constant 0 : i32
    %c0_i32_1 = arith.constant 0 : i32
    return %c0_i32, %c0_i32_0 : i32, i32
  }
  func.func @transform_2(%arg0: i32) -> (i32, i32) {
    %c0_i32 = arith.constant 0 : i32
    %c0_i32_0 = arith.constant 0 : i32
    %c0_i32_1 = arith.constant 0 : i32
    return %c0_i32, %c0_i32_0 : i32, i32
  }
  func.func @transform_3(%arg0: i32) -> (i32, i32, i32) {
    %c0_i32 = arith.constant 0 : i32
    %c0_i32_0 = arith.constant 0 : i32
    %c0_i32_1 = arith.constant 0 : i32
    %c0_i32_2 = arith.constant 0 : i32
    return %c0_i32, %c0_i32_0, %c0_i32_1 : i32, i32, i32
  }
  func.func @transform_4(%arg0: i32) -> (i32, i32, i32) {
    %c0_i32 = arith.constant 0 : i32
    %c0_i32_0 = arith.constant 0 : i32
    %c0_i32_1 = arith.constant 0 : i32
    %c0_i32_2 = arith.constant 0 : i32
    return %c0_i32, %c0_i32_0, %c0_i32_1 : i32, i32, i32
  }
  func.func @transform_5(%arg0: i32) -> (i32, i32) {
    %c0_i32 = arith.constant 0 : i32
    %c0_i32_0 = arith.constant 0 : i32
    %c0_i32_1 = arith.constant 0 : i32
    return %c0_i32, %c0_i32_0 : i32, i32
  }
  func.func @transform_6(%arg0: i32) -> (i32, i32) {
    %c0_i32 = arith.constant 0 : i32
    %c0_i32_0 = arith.constant 0 : i32
    %c0_i32_1 = arith.constant 0 : i32
    return %c0_i32, %c0_i32_0 : i32, i32
  }
  func.func @transform_7(%arg0: i32) -> (i32, i32) {
    %c0_i32 = arith.constant 0 : i32
    %c0_i32_0 = arith.constant 0 : i32
    return %arg0, %c0_i32 : i32, i32
  }
}

</mosaic_0001>

<bundles_post_ra>
// kernel: dgm_forward.1
= control target key start
LH: loop header
LB: loop body
LE: loop exit
PB: predicated region body
PF: predicated region fallthrough
CT: control target
= control target key end

     0   :  { %s1712_s0 = inlined_call_operand.vmem [shape: f32[8,6], index: 0, kind: input, shape index: {}]   ;;  %s1713_s1 = inlined_call_operand.hbm [shape: f32[6,832], index: 1, kind: input, shape index: {}]   ;;  %s1714_s2 = inlined_call_operand.hbm [shape: f32[64,192], index: 2, kind: input, shape index: {}]   ;;  %s1715_s3 = inlined_call_operand.hbm [shape: f32[3,64,128], index: 3, kind: input, shape index: {}]   ;;  %s1716_s4 = inlined_call_operand.hbm [shape: f32[3,64,64], index: 4, kind: input, shape index: {}]   ;;  %s1717_s5 = inlined_call_operand.vmem [shape: f32[1,64], index: 5, kind: input, shape index: {}]   ;;  %s1718_s6 = inlined_call_operand.<no memory space> [shape: f32[1,1], index: 6, kind: input, shape index: {}]   ;;  %s1719_s7 = inlined_call_operand.vmem [shape: f32[8,1], index: 7, kind: output, shape index: {}]  }
   0x1   :  { %v12_v0 = vstv %s1718_s6 }
   0x2   :  { %13 = vst [vmem:[#allocation2] sm:$0x1] %v12_v0 }
   0x3   :  { %14 = vsyncpa [#allocation4], 0 }
   0x4   :  { %15 = vsyncpa [#allocation6], 0 }
   0x5   :  { %16 = vsyncpa [#allocation9], 0  ;;  %s1499_s26 = smov [#allocation5]   ;;  %s1405_s30 = scalar_lea.hbm %s1714_s2, 2048 }
   0x6   :  { %s34_s27 = sshll.u32 %s1499_s26, 4  ;;  %p1406_p0 = scmp.ne.s32.totalorder %s1714_s2, %s1405_s30  ;;  %s35_s27 = int_to_ptr.vmem [resolvable:$true] %s34_s27 }
   0x7   :  { %p1409_p1 = scmp.lt.u32.totalorder %s1405_s30, %s1714_s2 }
   0x9   :  { %p1411_p2 = pnand %p1409_p1, %p1406_p0 }
   0xb   :  { %1414 = shalt.err (!%p1411_p2)
}
   0xc   :  { %s1415_s6 = scalar_lea.vmem %s35_s27, 2048  ;;  %p1420_p4 = scmp.lt.s32.totalorder %s35_s27, %s35_s27 }
   0xd   :  { %p1416_p3 = scmp.ne.s32.totalorder %s35_s27, %s1415_s6  ;;  %p1421_p5 = scmp.lt.s32.totalorder %s1415_s6, %s1415_s6 }
   0xf   :  { %p1422_p6 = por %p1421_p5, %p1420_p4 }
  0x11   :  { %p1423_p7 = pnand %p1422_p6, %p1416_p3 }
  0x13   :  { %1426 = shalt.err (!%p1423_p7)
}
  0x14   :  { %s1500_s12 = smov 256   ;;  %s1501_s13 = smov 16  }
  0x15   :  { %40 = dma.hbm_to_vmem [thread:$0]  %s1714_s2, 2048, %s35_s27, [#allocation6], %s1500_s12, %s1500_s12, %s1501_s13  }
  0x16   :  { %s1502_s16 = smov [#allocation3]   ;;  %s1503_s18 = smov [#allocation7]  }
  0x17   :  { %s25_s17 = sshll.u32 %s1502_s16, 4  ;;  %s46_s19 = sshll.u32 %s1503_s18, 4  ;;  %s26_s17 = int_to_ptr.vmem [resolvable:$true] %s25_s17  ;;  %s47_s19 = int_to_ptr.vmem [resolvable:$true] %s46_s19 }
  0x18   :  { %s1427_s22 = scalar_lea.hbm %s1713_s1, 896 }
  0x19   :  { %p1428_p8 = scmp.ne.s32.totalorder %s1713_s1, %s1427_s22  ;;  %p1431_p9 = scmp.lt.u32.totalorder %s1427_s22, %s1713_s1 }
  0x1b   :  { %p1433_p10 = pnand %p1431_p9, %p1428_p8 }
  0x1d   :  { %1436 = shalt.err (!%p1433_p10)
}
  0x1e   :  { %s1437_s2 = scalar_lea.vmem %s26_s17, 896  ;;  %p1442_p12 = scmp.lt.s32.totalorder %s26_s17, %s26_s17 }
  0x1f   :  { %p1438_p11 = scmp.ne.s32.totalorder %s26_s17, %s1437_s2  ;;  %p1443_p13 = scmp.lt.s32.totalorder %s1437_s2, %s1437_s2 }
  0x21   :  { %p1444_p0 = por %p1443_p13, %p1442_p12 }
  0x23   :  { %p1445_p1 = pnand %p1444_p0, %p1438_p11 }
  0x25   :  { %1448 = shalt.err (!%p1445_p1)
}
  0x26   :  { %28 = dma.hbm_to_vmem [thread:$0]  %s1713_s1, 896, %s26_s17, [#allocation4]  }
  0x27   :  { %s1449_s8 = scalar_lea.hbm %s1715_s3, 3072 }
  0x28   :  { %p1450_p2 = scmp.ne.s32.totalorder %s1715_s3, %s1449_s8  ;;  %p1453_p3 = scmp.lt.u32.totalorder %s1449_s8, %s1715_s3 }
  0x2a   :  { %p1455_p4 = pnand %p1453_p3, %p1450_p2 }
  0x2c   :  { %1458 = shalt.err (!%p1455_p4)
}
  0x2d   :  { %s1459_s12 = scalar_lea.vmem %s47_s19, 3072  ;;  %p1464_p6 = scmp.lt.s32.totalorder %s47_s19, %s47_s19 }
  0x2e   :  { %p1460_p5 = scmp.ne.s32.totalorder %s47_s19, %s1459_s12  ;;  %p1465_p7 = scmp.lt.s32.totalorder %s1459_s12, %s1459_s12 }
  0x30   :  { %p1466_p8 = por %p1465_p7, %p1464_p6 }
  0x32   :  { %p1467_p9 = pnand %p1466_p8, %p1460_p5 }
  0x34   :  { %1470 = shalt.err (!%p1467_p9)
}
  0x35   :  { %s1504_s1 = smov 128   ;;  %s1505_s13 = smov 8  }
  0x36   :  { %52 = dma.hbm_to_vmem [thread:$0]  %s1715_s3, 3072, %s47_s19, [#allocation6], %s1504_s1, %s1504_s1, %s1505_s13  }
  0x37   :  { %s1506_s16 = smov [#allocation8]   ;;  %s1471_s21 = scalar_lea.hbm %s1716_s4, 3072 }
  0x38   :  { %s58_s17 = sshll.u32 %s1506_s16, 4  ;;  %p1472_p10 = scmp.ne.s32.totalorder %s1716_s4, %s1471_s21  ;;  %s59_s17 = int_to_ptr.vmem [resolvable:$true] %s58_s17 }
  0x39   :  { %p1475_p11 = scmp.lt.u32.totalorder %s1471_s21, %s1716_s4 }
  0x3b   :  { %p1477_p12 = pnand %p1475_p11, %p1472_p10 }
  0x3d   :  { %1480 = shalt.err (!%p1477_p12)
}
  0x3e   :  { %s1481_s26 = scalar_lea.vmem %s59_s17, 3072  ;;  %p1486_p0 = scmp.lt.s32.totalorder %s59_s17, %s59_s17 }
  0x3f   :  { %p1482_p13 = scmp.ne.s32.totalorder %s59_s17, %s1481_s26  ;;  %p1487_p1 = scmp.lt.s32.totalorder %s1481_s26, %s1481_s26 }
  0x41   :  { %p1488_p2 = por %p1487_p1, %p1486_p0 }
  0x43   :  { %p1489_p3 = pnand %p1488_p2, %p1482_p13 }
  0x45   :  { %1492 = shalt.err (!%p1489_p3)
}
  0x46   :  { %64 = dma.hbm_to_vmem [thread:$0]  %s1716_s4, 3072, %s59_s17, [#allocation9], %s1504_s1, %s1504_s1, %s1505_s13  }
  0x47   :  { %1493 = dma.done.wait [#allocation4], 896  }
  0x48   :  { %1494 = vsyncadd [#allocation4], 4294966400 }
  0x49   :  { %1495 = dma.done.wait [#allocation6], 5120  }
  0x4a   :  { %1496 = vsyncadd [#allocation6], 4294962176 }
  0x4b   :  { %1497 = dma.done.wait [#allocation9], 3072  }
  0x4c   :  { %1498 = vsyncadd [#allocation9], 4294964224  ;;  %v1507_v1 = vmov 0.0   ;;  %vm93_vm0 = vcmask 1045504   ;;  %v83_v2 = vld [vmem:[#allocation3 + $0x8] sm:$0x3f] }
  0x4d   :  { %179 = vmatprep.mubr.f32.mxu1 %v1507_v1  ;;  %483 = vmatprep.mubr.f32.mxu0 %v1507_v1  ;;  %v82_v3 = vld [vmem:[#allocation3] sm:$0x3f]  ;;  %vm89_vm1 = vcmask 48128   ;;  %v85_v5 = vld [vmem:[#allocation3 + $0x18] sm:$0x3f]  ;;  %vm1508_vm2 = vmmov 0  }
  0x4e   :  { %v81_v4 = vld [vmem:[%s1712_s0] sm:$0xff]  ;;  %1090 = vmatprep.subr.msk.mxu1 %vm93_vm0, %v83_v2  ;;  %v84_v6 = vld [vmem:[#allocation3 + $0x10] sm:$0x3f]  ;;  %v87_v7 = vld [vmem:[#allocation3 + $0x28] sm:$0x3f]  ;;  %v1509_v18 = vmov 0.0|0.0  }
  0x4f   :  { %1091 = vmatpush1.msk.msra.mxu1 %vm93_vm0, %v82_v3  ;;  %v86_v8 = vld [vmem:[#allocation3 + $0x20] sm:$0x3f]  ;;  %v88_v9 = vld [vmem:[#allocation3 + $0x30] sm:$0x3f]  ;;  %v399_v13 = vld [vmem:[#allocation5] sm:$0xff]  ;;  %vm415_vm3 = vcmask 523264  }
  0x50   :  { %1092 = vmatmul.mubr.msk.f32.vlgmr.msra.gmra.mrb[0].mxu1 %vm89_vm1, %v81_v4  ;;  %1093 = vmatprep.subr.msk.mxu1 %vm93_vm0, %v85_v5  ;;  %v400_v10 = vld [vmem:[#allocation5 + $0x8] sm:$0xff]  ;;  %v402_v11 = vld [vmem:[#allocation5 + $0x18] sm:$0xff]  ;;  %v401_v14 = vld [vmem:[#allocation5 + $0x10] sm:$0xff]  ;;  %s1510_s0 = smov 64   ;;  %vm1081_vm4 = vcmask 7168  }
  0x51   :  { %1094 = vmatpush1.msk.msra.mxu1 %vm93_vm0, %v84_v6  ;;  %250 = vmatprep.mubr.f32.mxu1 %v1507_v1  ;;  %v1285_v12 = vpack.c.bf16 %v402_v11, %v400_v10  ;;  %v504_v15 = vld [vmem:[#allocation7] sm:$0xff]  ;;  %v1287_v16 = vpack.c.bf16 %v401_v14, %v399_v13  ;;  %v505_v17 = vld [vmem:[#allocation7 + $0x8] sm:$0xff]  ;;  %v406_v21 = vld [vmem:[#allocation5 + $0x38] sm:$0xff] }
  0x52   :  { %1096 = vmatprep.subr.msk.mxu1 %vm93_vm0, %v87_v7  ;;  %v1302_v19 = vpack.c.bf16 %v505_v17, %v504_v15  ;;  %v404_v20 = vld [vmem:[#allocation5 + $0x28] sm:$0xff]  ;;  %v403_v23 = vld [vmem:[#allocation5 + $0x20] sm:$0xff]  ;;  %v405_v24 = vld [vmem:[#allocation5 + $0x30] sm:$0xff] }
  0x53   :  { %1286 = vmatprep.subr.bf16.mxu0 %v1285_v12  ;;  %v1289_v22 = vpack.c.bf16 %v406_v21, %v404_v20  ;;  %v506_v25 = vld [vmem:[#allocation7 + $0x10] sm:$0xff]  ;;  %v1291_v26 = vpack.c.bf16 %v405_v24, %v403_v23  ;;  %v507_v27 = vld [vmem:[#allocation7 + $0x18] sm:$0xff]  ;;  %v408_v29 = vld [vmem:[#allocation5 + $0x48] sm:$0xff] }
  0x54   :  { %1095 = vmatmul.mubr.msk.f32.vlgmr.msra.gmra.mrb[2].mxu1 %vm89_vm1, %v81_v4  ;;  %1288 = vmatpush1.bf16.msra.mxu0 %v1287_v16  ;;  %v1305_v28 = vpack.c.bf16 %v507_v27, %v506_v25  ;;  %v410_v30 = vld [vmem:[#allocation5 + $0x58] sm:$0xff]  ;;  %v407_v31 = vld [vmem:[#allocation5 + $0x40] sm:$0xff]  ;;  %v409_v33 = vld [vmem:[#allocation5 + $0x50] sm:$0xff] }
  0x55   :  { %1097 = vmatpush1.msk.msra.mxu1 %vm93_vm0, %v86_v8  ;;  %321 = vmatprep.mubr.f32.mxu1 %v1507_v1  ;;  %v1293_v32 = vpack.c.bf16 %v410_v30, %v408_v29  ;;  %v508_v34 = vld [vmem:[#allocation7 + $0x20] sm:$0xff]  ;;  %v509_v35 = vld [vmem:[#allocation7 + $0x28] sm:$0xff]  ;;  %v1295_v36 = vpack.c.bf16 %v409_v33, %v407_v31  ;;  %v414_v39 = vld [vmem:[#allocation5 + $0x78] sm:$0xff] }
  0x56   :  { %1166 = vmatprep.subr.mxu1 %v1507_v1  ;;  %1290 = vmatprep.subr.bf16.mxu0 %v1289_v22  ;;  %v1308_v37 = vpack.c.bf16 %v509_v35, %v508_v34  ;;  %v412_v38 = vld [vmem:[#allocation5 + $0x68] sm:$0xff]  ;;  %v411_v40 = vld [vmem:[#allocation5 + $0x60] sm:$0xff]  ;;  %v413_v42 = vld [vmem:[#allocation5 + $0x70] sm:$0xff] }
  0x57   :  { %v1297_v41 = vpack.c.bf16 %v414_v39, %v412_v38  ;;  %v510_v43 = vld [vmem:[#allocation7 + $0x30] sm:$0xff]  ;;  %v511_v44 = vld [vmem:[#allocation7 + $0x38] sm:$0xff]  ;;  %v1299_v45 = vpack.c.bf16 %v413_v42, %v411_v40  ;;  %v589_v56 = vld [vmem:[#allocation8] sm:$0xff] }
  0x58   :  { %1098 = vmatmul.mubr.msk.f32.vlgmr.msra.gmra.mrb[4].mxu1 %vm89_vm1, %v81_v4  ;;  %1292 = vmatpush1.bf16.msra.mxu0 %v1291_v26  ;;  %v1311_v46 = vpack.c.bf16 %v511_v44, %v510_v43  ;;  %v590_v57 = vld [vmem:[#allocation8 + $0x8] sm:$0xff]  ;;  %v591_v58 = vld [vmem:[#allocation8 + $0x10] sm:$0xff]  ;;  %v592_v60 = vld [vmem:[#allocation8 + $0x18] sm:$0xff] }
  0x59   :  { %1167 = vmatpush3.msk.msra.mxu1 %vm93_vm0, %v88_v9  ;;  %1168 = vmatprep.mubr.msk.f32.mxu1 %vm1508_vm2, %v1507_v1  ;;  %v1314_v59 = vpack.c.bf16 %v590_v57, %v589_v56  ;;  %v1317_v61 = vpack.c.bf16 %v592_v60, %v591_v58  ;;  %v593_v62 = vld [vmem:[#allocation8 + $0x20] sm:$0xff]  ;;  %v594_v63 = vld [vmem:[#allocation8 + $0x28] sm:$0xff]  ;;  %v595_v2 = vld [vmem:[#allocation8 + $0x30] sm:$0xff] }
  0x5a   :  { %1301 = vmatprep.subr.bf16.mxu1 %v1509_v18  ;;  %1294 = vmatprep.subr.bf16.mxu0 %v1293_v32  ;;  %v1320_v0 = vpack.c.bf16 %v594_v63, %v593_v62  ;;  %v596_v3 = vld [vmem:[#allocation8 + $0x38] sm:$0xff]  ;;  %v685_v17 = vld [vmem:[#allocation7 + $0x40] sm:$0xff]  ;;  %v687_v20 = vld [vmem:[#allocation7 + $0x50] sm:$0xff] }
  0x5b   :  { %v688_v22 = vld [vmem:[#allocation7 + $0x58] sm:$0xff]  ;;  %v689_v24 = vld [vmem:[#allocation7 + $0x60] sm:$0xff]  ;;  %v690_v25 = vld [vmem:[#allocation7 + $0x68] sm:$0xff] }
  0x5c   :  { %1169 = vmatmul.mubr.msk.f32.vlgmr.msra.gmra.mrb[6].mxu1 %vm89_vm1, %v81_v4  ;;  %1296 = vmatpush1.bf16.msra.mxu0 %v1295_v36  ;;  %v1323_v4 = vpack.c.bf16 %v596_v3, %v595_v2  ;;  %v1329_v23 = vpack.c.bf16 %v688_v22, %v687_v20  ;;  %v1332_v27 = vpack.c.bf16 %v690_v25, %v689_v24  ;;  %v692_v29 = vld [vmem:[#allocation7 + $0x78] sm:$0xff]  ;;  %v773_v42 = vld [vmem:[#allocation8 + $0x48] sm:$0xff]  ;;  %v774_v43 = vld [vmem:[#allocation8 + $0x50] sm:$0xff] }
  0x5d   :  { %1187 = vmatprep.mubr.msk.f32.mxu1 %vm1508_vm2, %v1507_v1  ;;  %1303 = vmatpush3.bf16.msra.mxu1 %v1302_v19  ;;  %v686_v19 = vld [vmem:[#allocation7 + $0x48] sm:$0xff]  ;;  %v958_v24 = vld [vmem:[#allocation8 + $0x80] sm:$0xff] }
  0x5e   :  { %1304 = vmatprep.subr.bf16.mxu1 %v1509_v18  ;;  %1298 = vmatprep.subr.bf16.mxu0 %v1297_v41  ;;  %v1326_v21 = vpack.c.bf16 %v686_v19, %v685_v17  ;;  %v772_v41 = vld [vmem:[#allocation8 + $0x40] sm:$0xff]  ;;  %v959_v25 = vld [vmem:[#allocation8 + $0x88] sm:$0xff] }
  0x5f   :  { %v1338_v44 = vpack.c.bf16 %v773_v42, %v772_v41 }
  0x60   :  { %1300 = vmatpush1.bf16.msra.mxu0 %v1299_v45  ;;  %v775_v45 = vld [vmem:[#allocation8 + $0x58] sm:$0xff] }
  0x61   :  { %1306 = vmatpush3.bf16.msra.mxu1 %v1305_v28  ;;  %1313 = vmatprep.subr.bf16.mxu0 %v1509_v18  ;;  %v691_v28 = vld [vmem:[#allocation7 + $0x70] sm:$0xff] }
  0x62   :  { %1307 = vmatprep.subr.bf16.mxu1 %v1509_v18  ;;  %v1335_v31 = vpack.c.bf16 %v692_v29, %v691_v28  ;;  %v961_v28 = vld [vmem:[#allocation8 + $0x98] sm:$0xff]  ;;  %v962_v29 = vld [vmem:[#allocation8 + $0xa0] sm:$0xff] }
  0x65   :  { %1309 = vmatpush3.bf16.msra.mxu1 %v1308_v37 }
  0x66   :  { %1310 = vmatprep.subr.bf16.mxu1 %v1509_v18 }
  0x69   :  { %1312 = vmatpush3.bf16.msra.mxu1 %v1311_v46  ;;  %v1341_v46 = vpack.c.bf16 %v775_v45, %v774_v43 }
  0x6a   :  { %1325 = vmatprep.subr.bf16.mxu1 %v1509_v18 }
 0x123   :  { %v181_v47 = vpop.f32.mrb[0].mxu1 }
 0x124   :  { %v1631_v48 = vpop.f32.mrb[1].mxu1 }
 0x127   :  { %v1633_v49 = vpop.f32.mrb[2].mxu1 }
 0x128   :  { %v1635_v50 = vpop.f32.mrb[3].mxu1 }
 0x12b   :  { %v1637_v51 = vpop.f32.mrb[4].mxu1 }
 0x12c   :  { %v1639_v52 = vpop.f32.mrb[5].mxu1 }
 0x12f   :  { %v394_v53 = vpop.f32.mrb[6].mxu1 }
 0x130   :  { %1385 = vtanh.f32 %v394_v53  ;;  %v1170_v54 = vpop.f32.mrb[7].mxu1 }
 0x131   :  { %v778_v54 = vld [vmem:[#allocation8 + $0x70] sm:$0xff] }
 0x13a   :  { %v1386_v55 = vpop.eup %1385 }
 0x13b   :  { %1101 = vmatmul.mubr.msk.f32.vlgmr.msra.gmra.mrb[0].mxu0 %vm415_vm3, %v1386_v55  ;;  %1188 = vmatmul.mubr.msk.f32.vlgmr.msra.gmra.mrb[8].mxu1 %vm415_vm3, %v1386_v55 }
 0x13c   :  { %1206 = vmatprep.mubr.msk.f32.mxu0 %vm1508_vm2, %v1507_v1  ;;  %1225 = vmatprep.mubr.msk.f32.mxu1 %vm1508_vm2, %v1507_v1 }
 0x13d   :  { %1315 = vmatpush3.bf16.msra.mxu0 %v1314_v59  ;;  %1327 = vmatpush3.bf16.msra.mxu1 %v1326_v21 }
 0x13e   :  { %1316 = vmatprep.subr.bf16.mxu0 %v1509_v18  ;;  %1328 = vmatprep.subr.bf16.mxu1 %v1509_v18 }
 0x141   :  { %1318 = vmatpush3.bf16.msra.mxu0 %v1317_v61  ;;  %1330 = vmatpush3.bf16.msra.mxu1 %v1329_v23 }
 0x142   :  { %1319 = vmatprep.subr.bf16.mxu0 %v1509_v18  ;;  %1331 = vmatprep.subr.bf16.mxu1 %v1509_v18 }
 0x145   :  { %1321 = vmatpush3.bf16.msra.mxu0 %v1320_v0  ;;  %1333 = vmatpush3.bf16.msra.mxu1 %v1332_v27  ;;  %v1362_v27 = vpack.c.bf16 %v959_v25, %v958_v24 }
 0x146   :  { %1322 = vmatprep.subr.bf16.mxu0 %v1509_v18  ;;  %1334 = vmatprep.subr.bf16.mxu1 %v1509_v18 }
 0x149   :  { %1324 = vmatpush3.bf16.msra.mxu0 %v1323_v4  ;;  %1336 = vmatpush3.bf16.msra.mxu1 %v1335_v31  ;;  %v872_v4 = vld [vmem:[#allocation7 + $0x88] sm:$0xff] }
 0x14a   :  { %1337 = vmatprep.subr.bf16.mxu0 %v1509_v18  ;;  %1349 = vmatprep.subr.bf16.mxu1 %v1509_v18 }
 0x20e   :  { %v485_v5 = vpop.f32.mrb[0].mxu0  ;;  %v578_v6 = vpop.f32.mrb[8].mxu1 }
 0x20f   :  { %v1652_v7 = vadd.f32 %v485_v5, %v1635_v50  ;;  %v582_v8 = vadd.f32 %v578_v6, %v181_v47  ;;  %v1654_v9 = vpop.f32.mrb[1].mxu0  ;;  %v1189_v10 = vpop.f32.mrb[9].mxu1  ;;  %v776_v47 = vld [vmem:[#allocation8 + $0x60] sm:$0xff] }
 0x211   :  { %1387 = vtanh.f32 %v582_v8  ;;  %v874_v8 = vld [vmem:[#allocation7 + $0x98] sm:$0xff] }
 0x21b   :  { %v1388_v11 = vpop.eup %1387 }
 0x21c   :  { %585 = vrot.lane.b32.xlu0 %v1388_v11, %s1510_s0  ;;  %v678_v30 = vmul.f32 %v1388_v11, %v1386_v55 }
 0x220   :  { %491 = vrot.lane.b32.xlu0 %v485_v5, %s1510_s0  ;;  %v873_v5 = vld [vmem:[#allocation7 + $0x90] sm:$0xff] }
 0x221   :  { %v1353_v10 = vpack.c.bf16 %v874_v8, %v873_v5 }
 0x28e   :  { %v586_v12 = vpop.permute.xlu0 %585 }
 0x28f   :  { %v588_v13 = vmul.f32 %v1386_v55, %v586_v12  ;;  %v779_v55 = vld [vmem:[#allocation8 + $0x78] sm:$0xff]  ;;  %v875_v12 = vld [vmem:[#allocation7 + $0xa0] sm:$0xff] }
 0x290   :  { %v1347_v56 = vpack.c.bf16 %v779_v55, %v778_v54 }
 0x291   :  { %1207 = vmatmul.mubr.msk.f32.vlgmr.msra.gmra.mrb[2].mxu0 %vm415_vm3, %v588_v13  ;;  %v876_v13 = vld [vmem:[#allocation7 + $0xa8] sm:$0xff] }
 0x292   :  { %1244 = vmatprep.mubr.msk.f32.mxu0 %vm1508_vm2, %v1507_v1  ;;  %v492_v32 = vpop.permute.xlu0 %491  ;;  %1339 = vmatpush3.bf16.msra.mxu0 %v1338_v44 }
 0x293   :  { %v494_v33 = vadd.f32 %v492_v32, %v1631_v48  ;;  %1340 = vmatprep.subr.bf16.mxu0 %v1509_v18  ;;  %v964_v32 = vld [vmem:[#allocation8 + $0xb0] sm:$0xff] }
 0x296   :  { %1342 = vmatpush3.bf16.msra.mxu0 %v1341_v46 }
 0x297   :  { %1343 = vmatprep.subr.bf16.mxu0 %v1509_v18 }
 0x364   :  { %v666_v14 = vpop.f32.mrb[2].mxu0 }
 0x365   :  { %v670_v15 = vadd.f32 %v666_v14, %v1631_v48  ;;  %v1208_v16 = vpop.f32.mrb[3].mxu0  ;;  %v777_v48 = vld [vmem:[#allocation8 + $0x68] sm:$0xff]  ;;  %v878_v14 = vld [vmem:[#allocation7 + $0xb8] sm:$0xff] }
 0x366   :  { %v1344_v53 = vpack.c.bf16 %v777_v48, %v776_v47 }
 0x367   :  { %1389 = vtanh.f32 %v670_v15 }
 0x368   :  { %1391 = vtanh.f32 %v494_v33  ;;  %1345 = vmatpush3.bf16.msra.mxu0 %v1344_v53 }
 0x369   :  { %1346 = vmatprep.subr.bf16.mxu0 %v1509_v18 }
 0x36c   :  { %1348 = vmatpush3.bf16.msra.mxu0 %v1347_v56 }
 0x36d   :  { %1361 = vmatprep.subr.bf16.mxu0 %v1509_v18 }
 0x371   :  { %v1390_v26 = vpop.eup %1389 }
 0x372   :  { %674 = vrot.lane.b32.xlu1 %v1390_v26, %s1510_s0  ;;  %v1392_v34 = vpop.eup %1391  ;;  %v960_v26 = vld [vmem:[#allocation8 + $0x90] sm:$0xff] }
 0x373   :  { %v672_v36 = vsub.f32 1.0, %v1392_v34 }
 0x376   :  { %680 = vrot.lane.b32.xlu1 %v678_v30, %s1510_s0  ;;  %v963_v30 = vld [vmem:[#allocation8 + $0xa8] sm:$0xff] }
 0x377   :  { %v1368_v31 = vpack.c.bf16 %v963_v30, %v962_v29 }
 0x3e4   :  { %v675_v35 = vpop.permute.xlu1 %674 }
 0x3e5   :  { %v677_v37 = vmul.f32 %v675_v35, %v672_v36 }
 0x3e8   :  { %v681_v38 = vpop.permute.xlu1 %680 }
 0x3e9   :  { %v683_v39 = vadd.f32 %v681_v38, %v677_v37 }
 0x3eb   :  { %694 = vrot.lane.b32.xlu0 %v683_v39, %s1510_s0 }
 0x45d   :  { %v695_v40 = vpop.permute.xlu0 %694 }
 0x45e   :  { %1226 = vmatmul.mubr.msk.f32.vlgmr.msra.gmra.mrb[10].mxu1 %vm415_vm3, %v695_v40 }
 0x45f   :  { %1263 = vmatprep.mubr.msk.f32.mxu1 %vm1508_vm2, %v1507_v1 }
 0x531   :  { %v764_v57 = vpop.f32.mrb[10].mxu1 }
 0x532   :  { %v768_v58 = vadd.f32 %v764_v57, %v1633_v49  ;;  %v1227_v59 = vpop.f32.mrb[11].mxu1  ;;  %v871_v49 = vld [vmem:[#allocation7 + $0x80] sm:$0xff] }
 0x533   :  { %v1350_v6 = vpack.c.bf16 %v872_v4, %v871_v49 }
 0x534   :  { %1393 = vtanh.f32 %v768_v58 }
 0x535   :  { %1351 = vmatpush3.bf16.msra.mxu1 %v1350_v6 }
 0x536   :  { %1352 = vmatprep.subr.bf16.mxu1 %v1509_v18 }
 0x539   :  { %1354 = vmatpush3.bf16.msra.mxu1 %v1353_v10 }
 0x53a   :  { %1355 = vmatprep.subr.bf16.mxu1 %v1509_v18 }
 0x53e   :  { %v1394_v60 = vpop.eup %1393 }
 0x53f   :  { %v770_v61 = vmul.f32 %v1394_v60, %v683_v39  ;;  %v864_v62 = vmul.f32 %v1394_v60, %v695_v40  ;;  %v1109_v60 = vld [vmem:[#allocation2] ss:$0 sm:$0xff] }
 0x541   :  { %781 = vrot.lane.b32.xlu1 %v770_v61, %s1510_s0 }
 0x545   :  { %866 = vrot.lane.b32.xlu1 %v864_v62, %s1510_s0 }
 0x5b3   :  { %v782_v63 = vpop.permute.xlu1 %781 }
 0x5b4   :  { %1245 = vmatmul.mubr.msk.f32.vlgmr.msra.gmra.mrb[4].mxu0 %vm415_vm3, %v782_v63 }
 0x5b5   :  { %1282 = vmatprep.mubr.msk.f32.mxu0 %vm1508_vm2, %v1507_v1  ;;  %v1356_v1 = vpack.c.bf16 %v876_v13, %v875_v12  ;;  %1363 = vmatpush3.bf16.msra.mxu0 %v1362_v27 }
 0x5b6   :  { %1364 = vmatprep.subr.bf16.mxu0 %v1509_v18 }
 0x5b7   :  { %1357 = vmatpush3.bf16.msra.mxu1 %v1356_v1  ;;  %v867_v21 = vpop.permute.xlu1 %866 }
 0x5b8   :  { %1358 = vmatprep.subr.bf16.mxu1 %v1509_v18 }
 0x687   :  { %v851_v0 = vpop.f32.mrb[4].mxu0 }
 0x688   :  { %v855_v2 = vadd.f32 %v851_v0, %v1635_v50  ;;  %v1246_v3 = vpop.f32.mrb[5].mxu0  ;;  %v877_v50 = vld [vmem:[#allocation7 + $0xb0] sm:$0xff] }
 0x689   :  { %v1359_v15 = vpack.c.bf16 %v878_v14, %v877_v50 }
 0x68a   :  { %1395 = vtanh.f32 %v855_v2 }
 0x68b   :  { %1360 = vmatpush3.bf16.msra.mxu1 %v1359_v15  ;;  %1397 = vtanh.f32 %v1652_v7  ;;  %v1365_v7 = vpack.c.bf16 %v961_v28, %v960_v26 }
 0x68d   :  { %1366 = vmatpush3.bf16.msra.mxu0 %v1365_v7 }
 0x68e   :  { %1367 = vmatprep.subr.bf16.mxu0 %v1509_v18 }
 0x691   :  { %1369 = vmatpush3.bf16.msra.mxu0 %v1368_v31 }
 0x692   :  { %1370 = vmatprep.subr.bf16.mxu0 %v1509_v18 }
 0x694   :  { %v1396_v11 = vpop.eup %1395 }
 0x695   :  { %859 = vrot.lane.b32.xlu0 %v1396_v11, %s1510_s0  ;;  %v1398_v16 = vpop.eup %1397 }
 0x696   :  { %v857_v17 = vsub.f32 1.0, %v1398_v16 }
 0x707   :  { %v860_v19 = vpop.permute.xlu0 %859 }
 0x708   :  { %v862_v20 = vmul.f32 %v860_v19, %v857_v17 }
 0x70a   :  { %v869_v22 = vadd.f32 %v867_v21, %v862_v20 }
 0x70c   :  { %880 = vrot.lane.b32.xlu0 %v869_v22, %s1510_s0 }
 0x710   :  { %499 = vrot.lane.b32.xlu0 %v1654_v9, %s1510_s0  ;;  %v965_v9 = vld [vmem:[#allocation8 + $0xb8] sm:$0xff] }
 0x711   :  { %v1371_v33 = vpack.c.bf16 %v965_v9, %v964_v32 }
 0x713   :  { %1372 = vmatpush3.bf16.msra.mxu0 %v1371_v33 }
 0x77e   :  { %v881_v23 = vpop.permute.xlu0 %880 }
 0x77f   :  { %1264 = vmatmul.mubr.msk.f32.vlgmr.msra.gmra.mrb[12].mxu1 %vm415_vm3, %v881_v23 }
 0x782   :  { %v500_v44 = vpop.permute.xlu0 %499 }
 0x783   :  { %v502_v45 = vadd.f32 %v500_v44, %v1639_v52 }
 0x852   :  { %v950_v34 = vpop.f32.mrb[12].mxu1 }
 0x853   :  { %v954_v35 = vadd.f32 %v950_v34, %v1637_v51  ;;  %v1265_v36 = vpop.f32.mrb[13].mxu1  ;;  %v1108_v51 = vld [vmem:[%s1717_s5] ss:$0 sm:$0xff] }
 0x855   :  { %1399 = vtanh.f32 %v954_v35 }
 0x85f   :  { %v1400_v37 = vpop.eup %1399 }
 0x860   :  { %v1050_v38 = vmul.f32 %v1400_v37, %v881_v23  ;;  %v956_v39 = vmul.f32 %v1400_v37, %v869_v22 }
 0x862   :  { %1052 = vrot.lane.b32.xlu0 %v1050_v38, %s1510_s0  ;;  %967 = vrot.lane.b32.xlu1 %v956_v39, %s1510_s0 }
 0x8d4   :  { %v968_v40 = vpop.permute.xlu1 %967  ;;  %v1053_v54 = vpop.permute.xlu0 %1052 }
 0x8d5   :  { %1283 = vmatmul.mubr.msk.f32.vlgmr.msra.gmra.mrb[6].mxu0 %vm415_vm3, %v968_v40 }
 0x9a8   :  { %v1037_v41 = vpop.f32.mrb[6].mxu0 }
 0x9a9   :  { %v1041_v42 = vadd.f32 %v1037_v41, %v1639_v52  ;;  %v1284_v18 = vpop.f32.mrb[7].mxu0 }
 0x9ab   :  { %1401 = vtanh.f32 %v1041_v42 }
 0x9ac   :  { %1403 = vtanh.f32 %v502_v45 }
 0x9b5   :  { %v1402_v43 = vpop.eup %1401 }
 0x9b6   :  { %1045 = vrot.lane.b32.xlu1 %v1402_v43, %s1510_s0  ;;  %v1404_v46 = vpop.eup %1403 }
 0x9b7   :  { %v1043_v47 = vsub.f32 1.0, %v1404_v46 }
 0x9ba   :  { %1062 = vrot.lane.b32.xlu1 %v1108_v51, %s1510_s0 }
 0xa28   :  { %v1046_v48 = vpop.permute.xlu1 %1045 }
 0xa29   :  { %v1048_v53 = vmul.f32 %v1046_v48, %v1043_v47 }
 0xa2b   :  { %v1055_v55 = vadd.f32 %v1053_v54, %v1048_v53 }
 0xa2c   :  { %v1063_v56 = vpop.permute.xlu1 %1062 }
 0xa2d   :  { %v1065_v57 = vmul.f32 %v1063_v56, %v1055_v55 }
 0xa2f   :  { %1067 = vrot.lane.b32.xlu0 %v1065_v57, %s1510_s0 }
 0xaa1   :  { %v1068_v58 = vpop.permute.xlu0 %1067 }
 0xaa2   :  { %v1070_v59 = vsel %vm415_vm3, %v1068_v58, 0.0 }
 0xaa3   :  { %1071 = vadd.xlane.f32.xlu1 %v1070_v59 }
 0xb30   :  { %v1072_v61 = vpop.xlane.xlu1 %1071 }
 0xb31   :  { %v1080_v62 = vadd.f32 %v1109_v60, %v1072_v61 }
 0xb33   :  { %1082 = vst.msk [vmem:[%s1719_s7] sm:$0xff] %vm1081_vm4, %v1080_v62 }
 0xb34   :  { %1087 = vsyncpa [#allocation4], 1 }
 0xb35   :  { %1088 = vsyncpa [#allocation6], 1 }
 0xb36   :  { %1089 = vsyncpa [#allocation9], 1 }

</bundles_post_ra>
